<compile_context>
chip_gen: v7x
topology: tpu7x:2x2x1
jax: 0.10.0
libtpu: 0.0.40
codegen_flags: <defaults>
</compile_context>

<pallas_src>
import functools

import jax
import jax.numpy as jnp
from jax.experimental import pallas as pl
from jax.experimental.pallas import tpu as pltpu

HIDDEN = 256


def _round_up(x, m):
    return ((x + m - 1) // m) * m


def _critic_kernel(state_ref, action_ref,
                   w1s_ref, w1a_ref, b1_ref,
                   w12_ref, b12_ref, w22_ref, b22_ref,
                   w3_ref, b3_ref,
                   q_ref):
    # Activations cast to bf16 for the MXU; accumulate in f32.
    s = state_ref[...].astype(jnp.bfloat16)
    a = action_ref[...].astype(jnp.bfloat16)

    # Fused first layer of both critics: [TB, 2*HIDDEN]
    h_all = (jnp.dot(s, w1s_ref[...], preferred_element_type=jnp.float32)
             + jnp.dot(a, w1a_ref[...], preferred_element_type=jnp.float32)
             + b1_ref[...])
    h_all = jnp.maximum(h_all, 0.0)

    h = h_all[:, :HIDDEN].astype(jnp.bfloat16)   # critic 1 hidden
    g = h_all[:, HIDDEN:].astype(jnp.bfloat16)   # critic 2 hidden

    h2 = jnp.maximum(
        jnp.dot(h, w12_ref[...], preferred_element_type=jnp.float32) + b12_ref[...],
        0.0)
    g2 = jnp.maximum(
        jnp.dot(g, w22_ref[...], preferred_element_type=jnp.float32) + b22_ref[...],
        0.0)

    # Fused (block-diagonal) final layer -> single lane-dense [TB, 2] store.
    hg = jnp.concatenate([h2.astype(jnp.bfloat16), g2.astype(jnp.bfloat16)], axis=-1)
    q = jnp.dot(hg, w3_ref[...], preferred_element_type=jnp.float32) + b3_ref[...]
    q_ref[...] = q.astype(q_ref.dtype)


def _prepare_params(params, state_dim):
    """Build the fused / bf16 weight layout consumed by the kernel."""
    wdt = jnp.bfloat16
    w11, w21 = params["w11"], params["w21"]
    # Split the first-layer weights into state / action halves and fuse the two
    # critics along the output axis: [state_dim, 512], [action_dim, 512].
    w1s = jnp.concatenate([w11[:state_dim], w21[:state_dim]], axis=1).astype(wdt)
    w1a = jnp.concatenate([w11[state_dim:], w21[state_dim:]], axis=1).astype(wdt)
    b1 = jnp.concatenate([params["b11"], params["b21"]], axis=1).astype(jnp.float32)

    w12 = params["w12"].astype(wdt)
    w22 = params["w22"].astype(wdt)
    b12 = params["b12"].astype(jnp.float32)
    b22 = params["b22"].astype(jnp.float32)

    # Block-diagonal fused final layer: [2*HIDDEN, 2]
    w13, w23 = params["w13"], params["w23"]
    zeros = jnp.zeros_like(w13)
    w3 = jnp.concatenate(
        [jnp.concatenate([w13, zeros], axis=1),
         jnp.concatenate([zeros, w23], axis=1)], axis=0).astype(wdt)
    b3 = jnp.concatenate([params["b13"], params["b23"]], axis=1).astype(jnp.float32)
    return w1s, w1a, b1, w12, b12, w22, b22, w3, b3


@jax.jit
def critic_forward(state, action, params):
    """Equivalent of Critic.forward(state, action) -> (q1, q2)."""
    B, state_dim = state.shape
    action_dim = action.shape[1]
    in_dim = state_dim + action_dim

    prep = _prepare_params(params, state_dim)
    w1s, w1a, b1, w12, b12, w22, b22, w3, b3 = prep

    # Batch tile: multiple of 8 (sublane), capped at 512 (safe for v7x 64 MiB VMEM).
    TB = min(512, _round_up(B, 8))
    Bp = _round_up(B, TB)
    if Bp != B:
        pad = Bp - B
        state = jnp.pad(state, ((0, pad), (0, 0)))
        action = jnp.pad(action, ((0, pad), (0, 0)))

    grid = (Bp // TB,)
    row_map = lambda i: (i, 0)     # activations / output: walk the batch axis
    const_map = lambda i: (0, 0)   # weights/biases: resident across grid steps

    flops = 2 * Bp * (in_dim * 2 * HIDDEN + 2 * HIDDEN * HIDDEN + 2 * HIDDEN * 2)
    bytes_accessed = (
        state.size * 4 + action.size * 4 + Bp * 2 * 4
        + sum(int(x.size) * x.dtype.itemsize for x in prep))

    q = pl.pallas_call(
        _critic_kernel,
        out_shape=jax.ShapeDtypeStruct((Bp, 2), jnp.float32),
        grid_spec=pltpu.PrefetchScalarGridSpec(
            num_scalar_prefetch=0,
            grid=grid,
            in_specs=[
                pl.BlockSpec((TB, state_dim), row_map),
                pl.BlockSpec((TB, action_dim), row_map),
                pl.BlockSpec(w1s.shape, const_map),
                pl.BlockSpec(w1a.shape, const_map),
                pl.BlockSpec(b1.shape, const_map),
                pl.BlockSpec(w12.shape, const_map),
                pl.BlockSpec(b12.shape, const_map),
                pl.BlockSpec(w22.shape, const_map),
                pl.BlockSpec(b22.shape, const_map),
                pl.BlockSpec(w3.shape, const_map),
                pl.BlockSpec(b3.shape, const_map),
            ],
            out_specs=pl.BlockSpec((TB, 2), row_map),
        ),
        compiler_params=pltpu.CompilerParams(
            dimension_semantics=("parallel",)),
        cost_estimate=pl.CostEstimate(
            flops=flops, transcendentals=0, bytes_accessed=bytes_accessed),
    )(state, action, w1s, w1a, b1, w12, b12, w22, b22, w3, b3)

    return q[:B, 0:1], q[:B, 1:2]


def init_critic_params(key, state_dim, action_dim, hidden=HIDDEN):
    """PyTorch-style init: U(-1/sqrt(fan_in), 1/sqrt(fan_in)).

    Weights stored as [in_features, out_features]; biases as [1, out_features].
    """
    in_dim = state_dim + action_dim
    layer_dims = [(in_dim, hidden), (hidden, hidden), (hidden, 1)]
    params = {}
    keys = jax.random.split(key, 12)
    ki = 0
    for critic_idx in (1, 2):
        for layer_idx, (fan_in, fan_out) in enumerate(layer_dims, start=1):
            bound = 1.0 / jnp.sqrt(float(fan_in))
            w = jax.random.uniform(keys[ki], (fan_in, fan_out),
                                   minval=-bound, maxval=bound, dtype=jnp.float32)
            ki += 1
            b = jax.random.uniform(keys[ki], (1, fan_out),
                                   minval=-bound, maxval=bound, dtype=jnp.float32)
            ki += 1
            params[f"w{critic_idx}{layer_idx}"] = w
            params[f"b{critic_idx}{layer_idx}"] = b
    return params


def critic_forward_ref(state, action, params):
    """Pure-JAX reference with the same mixed precision (bf16 in, f32 accum)."""
    def dot(x, w):
        return jnp.dot(x.astype(jnp.bfloat16), w.astype(jnp.bfloat16),
                       preferred_element_type=jnp.float32)

    sa = jnp.concatenate([state, action], axis=1)

    def mlp(i):
        h = jnp.maximum(dot(sa, params[f"w{i}1"]) + params[f"b{i}1"], 0.0)
        h = jnp.maximum(dot(h, params[f"w{i}2"]) + params[f"b{i}2"], 0.0)
        return dot(h, params[f"w{i}3"]) + params[f"b{i}3"]

    return mlp(1), mlp(2)


if __name__ == "__main__":
    # TODO(synk): optimizer / checkpoint save-load from the PyTorch module are host
    # concerns, not part of the forward kernel.
    STATE_DIM, ACTION_DIM = 24, 8

    key = jax.random.PRNGKey(0)
    k_params, k_state, k_action = jax.random.split(key, 3)
    params = init_critic_params(k_params, STATE_DIM, ACTION_DIM)

    ok = True
    for B in (8, 600):  # small single-tile case + multi-tile case with padding
        ks, ka = jax.random.split(jax.random.fold_in(k_state, B))
        state = jax.random.normal(ks, (B, STATE_DIM), dtype=jnp.float32)
        action = jax.random.uniform(ka, (B, ACTION_DIM),
                                    minval=-1.0, maxval=1.0, dtype=jnp.float32)

        q1, q2 = critic_forward(state, action, params)
        q1 = jax.block_until_ready(q1)
        q2 = jax.block_until_ready(q2)

        q1_ref, q2_ref = critic_forward_ref(state, action, params)
        assert q1.shape == (B, 1) and q2.shape == (B, 1)
        ok &= bool(jnp.allclose(q1, q1_ref, atol=2e-2, rtol=2e-2))
        ok &= bool(jnp.allclose(q2, q2_ref, atol=2e-2, rtol=2e-2))

    assert ok
    print("KERNEL_OK")
</pallas_src>

<mosaic_0001>
module attributes {stable_mosaic.version = 11 : i64} {
  func.func @_critic_kernel(%arg0: i32, %arg1: memref<8x24xf32, #tpu.memory_space<vmem>>, %arg2: memref<8x8xf32, #tpu.memory_space<vmem>>, %arg3: memref<24x512xbf16, #tpu.memory_space<vmem>>, %arg4: memref<8x512xbf16, #tpu.memory_space<vmem>>, %arg5: memref<1x512xf32, #tpu.memory_space<vmem>>, %arg6: memref<256x256xbf16, #tpu.memory_space<vmem>>, %arg7: memref<1x256xf32, #tpu.memory_space<vmem>>, %arg8: memref<256x256xbf16, #tpu.memory_space<vmem>>, %arg9: memref<1x256xf32, #tpu.memory_space<vmem>>, %arg10: memref<512x2xbf16, #tpu.memory_space<vmem>>, %arg11: memref<1x2xf32, #tpu.memory_space<vmem>>, %arg12: memref<8x2xf32, #tpu.memory_space<vmem>>) attributes {dimension_semantics = [#tpu.dimension_semantics<parallel>], iteration_bounds = array<i64: 1>, scalar_prefetch = 0 : i64, scratch_operands = 0 : i64, tpu.core_type = #tpu.core_type<tc>, window_params = [{transform_indices = @transform_0, window_bounds = array<i64: 8, 24>}, {transform_indices = @transform_1, window_bounds = array<i64: 8, 8>}, {pipeline_mode = #tpu.pipeline_mode<synchronous>, transform_indices = @transform_2, window_bounds = array<i64: 24, 512>}, {pipeline_mode = #tpu.pipeline_mode<synchronous>, transform_indices = @transform_3, window_bounds = array<i64: 8, 512>}, {pipeline_mode = #tpu.pipeline_mode<synchronous>, transform_indices = @transform_4, window_bounds = array<i64: 1, 512>}, {pipeline_mode = #tpu.pipeline_mode<synchronous>, transform_indices = @transform_5, window_bounds = array<i64: 256, 256>}, {pipeline_mode = #tpu.pipeline_mode<synchronous>, transform_indices = @transform_6, window_bounds = array<i64: 1, 256>}, {pipeline_mode = #tpu.pipeline_mode<synchronous>, transform_indices = @transform_7, window_bounds = array<i64: 256, 256>}, {pipeline_mode = #tpu.pipeline_mode<synchronous>, transform_indices = @transform_8, window_bounds = array<i64: 1, 256>}, {pipeline_mode = #tpu.pipeline_mode<synchronous>, transform_indices = @transform_9, window_bounds = array<i64: 512, 2>}, {pipeline_mode = #tpu.pipeline_mode<synchronous>, transform_indices = @transform_10, window_bounds = array<i64: 1, 2>}, {transform_indices = @transform_11, window_bounds = array<i64: 8, 2>}]} {
    %c0 = arith.constant 0 : index
    %c0_0 = arith.constant 0 : index
    %0 = vector.load %arg1[%c0, %c0_0] : memref<8x24xf32, #tpu.memory_space<vmem>>, vector<8x24xf32>
    %1 = arith.truncf %0 : vector<8x24xf32> to vector<8x24xbf16>
    %c0_1 = arith.constant 0 : index
    %c0_2 = arith.constant 0 : index
    %2 = vector.load %arg2[%c0_1, %c0_2] : memref<8x8xf32, #tpu.memory_space<vmem>>, vector<8x8xf32>
    %3 = arith.truncf %2 : vector<8x8xf32> to vector<8x8xbf16>
    %c0_3 = arith.constant 0 : index
    %c0_4 = arith.constant 0 : index
    %4 = vector.load %arg3[%c0_3, %c0_4] : memref<24x512xbf16, #tpu.memory_space<vmem>>, vector<24x512xbf16>
    %cst = arith.constant dense<0.000000e+00> : vector<8x512xf32>
    %5 = tpu.matmul %1, %4, %cst {dimension_numbers = #tpu.dot_dimension_numbers<[1], [0], [0], [1], [0, 0, 1, 1], [], []>} : vector<8x24xbf16>, vector<24x512xbf16>, vector<8x512xf32> -> vector<8x512xf32>
    %c0_5 = arith.constant 0 : index
    %c0_6 = arith.constant 0 : index
    %6 = vector.load %arg4[%c0_5, %c0_6] : memref<8x512xbf16, #tpu.memory_space<vmem>>, vector<8x512xbf16>
    %cst_7 = arith.constant dense<0.000000e+00> : vector<8x512xf32>
    %7 = tpu.matmul %3, %6, %cst_7 {dimension_numbers = #tpu.dot_dimension_numbers<[1], [0], [0], [1], [0, 0, 1, 1], [], []>} : vector<8x8xbf16>, vector<8x512xbf16>, vector<8x512xf32> -> vector<8x512xf32>
    %8 = arith.addf %5, %7 : vector<8x512xf32>
    %c0_8 = arith.constant 0 : index
    %c0_9 = arith.constant 0 : index
    %9 = vector.load %arg5[%c0_8, %c0_9] : memref<1x512xf32, #tpu.memory_space<vmem>>, vector<1x512xf32>
    %10 = vector.broadcast %9 : vector<1x512xf32> to vector<8x512xf32>
    %11 = arith.addf %8, %10 : vector<8x512xf32>
    %cst_10 = arith.constant 0.000000e+00 : f32
    %12 = vector.broadcast %cst_10 : f32 to vector<8x512xf32>
    %13 = arith.maximumf %11, %12 : vector<8x512xf32>
    %14 = vector.extract_strided_slice %13 {offsets = [0, 0], sizes = [8, 256], strides = [1, 1]} : vector<8x512xf32> to vector<8x256xf32>
    %15 = arith.truncf %14 : vector<8x256xf32> to vector<8x256xbf16>
    %16 = vector.extract_strided_slice %13 {offsets = [0, 256], sizes = [8, 256], strides = [1, 1]} : vector<8x512xf32> to vector<8x256xf32>
    %17 = arith.truncf %16 : vector<8x256xf32> to vector<8x256xbf16>
    %c0_11 = arith.constant 0 : index
    %c0_12 = arith.constant 0 : index
    %18 = vector.load %arg6[%c0_11, %c0_12] : memref<256x256xbf16, #tpu.memory_space<vmem>>, vector<256x256xbf16>
    %cst_13 = arith.constant dense<0.000000e+00> : vector<8x256xf32>
    %19 = tpu.matmul %15, %18, %cst_13 {dimension_numbers = #tpu.dot_dimension_numbers<[1], [0], [0], [1], [0, 0, 1, 1], [], []>} : vector<8x256xbf16>, vector<256x256xbf16>, vector<8x256xf32> -> vector<8x256xf32>
    %c0_14 = arith.constant 0 : index
    %c0_15 = arith.constant 0 : index
    %20 = vector.load %arg7[%c0_14, %c0_15] : memref<1x256xf32, #tpu.memory_space<vmem>>, vector<1x256xf32>
    %21 = vector.broadcast %20 : vector<1x256xf32> to vector<8x256xf32>
    %22 = arith.addf %19, %21 : vector<8x256xf32>
    %cst_16 = arith.constant 0.000000e+00 : f32
    %23 = vector.broadcast %cst_16 : f32 to vector<8x256xf32>
    %24 = arith.maximumf %22, %23 : vector<8x256xf32>
    %c0_17 = arith.constant 0 : index
    %c0_18 = arith.constant 0 : index
    %25 = vector.load %arg8[%c0_17, %c0_18] : memref<256x256xbf16, #tpu.memory_space<vmem>>, vector<256x256xbf16>
    %cst_19 = arith.constant dense<0.000000e+00> : vector<8x256xf32>
    %26 = tpu.matmul %17, %25, %cst_19 {dimension_numbers = #tpu.dot_dimension_numbers<[1], [0], [0], [1], [0, 0, 1, 1], [], []>} : vector<8x256xbf16>, vector<256x256xbf16>, vector<8x256xf32> -> vector<8x256xf32>
    %c0_20 = arith.constant 0 : index
    %c0_21 = arith.constant 0 : index
    %27 = vector.load %arg9[%c0_20, %c0_21] : memref<1x256xf32, #tpu.memory_space<vmem>>, vector<1x256xf32>
    %28 = vector.broadcast %27 : vector<1x256xf32> to vector<8x256xf32>
    %29 = arith.addf %26, %28 : vector<8x256xf32>
    %cst_22 = arith.constant 0.000000e+00 : f32
    %30 = vector.broadcast %cst_22 : f32 to vector<8x256xf32>
    %31 = arith.maximumf %29, %30 : vector<8x256xf32>
    %32 = arith.truncf %24 : vector<8x256xf32> to vector<8x256xbf16>
    %33 = arith.truncf %31 : vector<8x256xf32> to vector<8x256xbf16>
    %34 = tpu.concatenate %32, %33 in 1 : vector<8x256xbf16>, vector<8x256xbf16> -> vector<8x512xbf16>
    %c0_23 = arith.constant 0 : index
    %c0_24 = arith.constant 0 : index
    %35 = vector.load %arg10[%c0_23, %c0_24] : memref<512x2xbf16, #tpu.memory_space<vmem>>, vector<512x2xbf16>
    %cst_25 = arith.constant dense<0.000000e+00> : vector<8x2xf32>
    %36 = tpu.matmul %34, %35, %cst_25 {dimension_numbers = #tpu.dot_dimension_numbers<[1], [0], [0], [1], [0, 0, 1, 1], [], []>} : vector<8x512xbf16>, vector<512x2xbf16>, vector<8x2xf32> -> vector<8x2xf32>
    %c0_26 = arith.constant 0 : index
    %c0_27 = arith.constant 0 : index
    %37 = vector.load %arg11[%c0_26, %c0_27] : memref<1x2xf32, #tpu.memory_space<vmem>>, vector<1x2xf32>
    %38 = vector.broadcast %37 : vector<1x2xf32> to vector<8x2xf32>
    %39 = arith.addf %36, %38 : vector<8x2xf32>
    %c0_28 = arith.constant 0 : index
    %c0_29 = arith.constant 0 : index
    %40 = vector.load %arg12[%c0_28, %c0_29] : memref<8x2xf32, #tpu.memory_space<vmem>>, vector<8x2xf32>
    tpu.vector_store %arg12[%c0_28, %c0_29], %39 {strides = array<i32>} : memref<8x2xf32, #tpu.memory_space<vmem>>, vector<8x2xf32>,
    return
  }
  func.func @transform_0(%arg0: i32) -> (i32, i32) {
    %c0_i32 = arith.constant 0 : i32
    %c0_i32_0 = arith.constant 0 : i32
    return %arg0, %c0_i32 : i32, i32
  }
  func.func @transform_1(%arg0: i32) -> (i32, i32) {
    %c0_i32 = arith.constant 0 : i32
    %c0_i32_0 = arith.constant 0 : i32
    return %arg0, %c0_i32 : i32, i32
  }
  func.func @transform_2(%arg0: i32) -> (i32, i32) {
    %c0_i32 = arith.constant 0 : i32
    %c0_i32_0 = arith.constant 0 : i32
    %c0_i32_1 = arith.constant 0 : i32
    return %c0_i32, %c0_i32_0 : i32, i32
  }
  func.func @transform_3(%arg0: i32) -> (i32, i32) {
    %c0_i32 = arith.constant 0 : i32
    %c0_i32_0 = arith.constant 0 : i32
    %c0_i32_1 = arith.constant 0 : i32
    return %c0_i32, %c0_i32_0 : i32, i32
  }
  func.func @transform_4(%arg0: i32) -> (i32, i32) {
    %c0_i32 = arith.constant 0 : i32
    %c0_i32_0 = arith.constant 0 : i32
    %c0_i32_1 = arith.constant 0 : i32
    return %c0_i32, %c0_i32_0 : i32, i32
  }
  func.func @transform_5(%arg0: i32) -> (i32, i32) {
    %c0_i32 = arith.constant 0 : i32
    %c0_i32_0 = arith.constant 0 : i32
    %c0_i32_1 = arith.constant 0 : i32
    return %c0_i32, %c0_i32_0 : i32, i32
  }
  func.func @transform_6(%arg0: i32) -> (i32, i32) {
    %c0_i32 = arith.constant 0 : i32
    %c0_i32_0 = arith.constant 0 : i32
    %c0_i32_1 = arith.constant 0 : i32
    return %c0_i32, %c0_i32_0 : i32, i32
  }
  func.func @transform_7(%arg0: i32) -> (i32, i32) {
    %c0_i32 = arith.constant 0 : i32
    %c0_i32_0 = arith.constant 0 : i32
    %c0_i32_1 = arith.constant 0 : i32
    return %c0_i32, %c0_i32_0 : i32, i32
  }
  func.func @transform_8(%arg0: i32) -> (i32, i32) {
    %c0_i32 = arith.constant 0 : i32
    %c0_i32_0 = arith.constant 0 : i32
    %c0_i32_1 = arith.constant 0 : i32
    return %c0_i32, %c0_i32_0 : i32, i32
  }
  func.func @transform_9(%arg0: i32) -> (i32, i32) {
    %c0_i32 = arith.constant 0 : i32
    %c0_i32_0 = arith.constant 0 : i32
    %c0_i32_1 = arith.constant 0 : i32
    return %c0_i32, %c0_i32_0 : i32, i32
  }
  func.func @transform_10(%arg0: i32) -> (i32, i32) {
    %c0_i32 = arith.constant 0 : i32
    %c0_i32_0 = arith.constant 0 : i32
    %c0_i32_1 = arith.constant 0 : i32
    return %c0_i32, %c0_i32_0 : i32, i32
  }
  func.func @transform_11(%arg0: i32) -> (i32, i32) {
    %c0_i32 = arith.constant 0 : i32
    %c0_i32_0 = arith.constant 0 : i32
    return %arg0, %c0_i32 : i32, i32
  }
}

</mosaic_0001>

<bundles_post_ra>
// kernel: critic_forward.1
= control target key start
LH: loop header
LB: loop body
LE: loop exit
PB: predicated region body
PF: predicated region fallthrough
CT: control target
= control target key end

     0   :  { %vm65_vm0 = vcmask 1043456   ;;  %v1473_v2 = vmov 0   ;;  %vm61_vm1 = vcmask 64512   ;;  %vm190_vm2 = vcmask 195584   ;;  %s1885_s3 = inlined_call_operand.vmem [shape: bf16[8,512], index: 3, kind: input, shape index: {}]   ;;  %s1886_s1 = inlined_call_operand.vmem [shape: f32[8,8], index: 1, kind: input, shape index: {}]   ;;  %s1887_s2 = inlined_call_operand.vmem [shape: bf16[24,512], index: 2, kind: input, shape index: {}]   ;;  %s1888_s5 = inlined_call_operand.vmem [shape: bf16[256,256], index: 5, kind: input, shape index: {}]   ;;  %s1889_s0 = inlined_call_operand.vmem [shape: f32[8,24], index: 0, kind: input, shape index: {}]   ;;  %s1890_s7 = inlined_call_operand.vmem [shape: bf16[256,256], index: 7, kind: input, shape index: {}]   ;;  %s1891_s9 = inlined_call_operand.vmem [shape: bf16[512,2], index: 9, kind: input, shape index: {}]   ;;  %s1892_s4 = inlined_call_operand.vmem [shape: f32[1,512], index: 4, kind: input, shape index: {}]   ;;  %s1893_s6 = inlined_call_operand.vmem [shape: f32[1,256], index: 6, kind: input, shape index: {}]   ;;  %s1894_s8 = inlined_call_operand.vmem [shape: f32[1,256], index: 8, kind: input, shape index: {}]   ;;  %s1895_s10 = inlined_call_operand.vmem [shape: f32[1,2], index: 10, kind: input, shape index: {}]   ;;  %s1896_s11 = inlined_call_operand.vmem [shape: f32[8,2], index: 11, kind: output, shape index: {}]  }
   0x1   :  { %v49_v0 = vld [vmem:[%s1885_s3] sm:$0xff]  ;;  %v50_v1 = vld [vmem:[%s1885_s3 + $0x8] sm:$0xff]  ;;  %110 = vmatprep.mubr.bf16.mxu0 %v1473_v2  ;;  %151 = vmatprep.mubr.bf16.mxu1 %v1473_v2  ;;  %v1353_v29 = vld [vmem:[%s1888_s5 + $0x14] ss:$8 sps:$4 sm:$0xff]   ;;  %vm1163_vm3 = vcmask 15360  }
   0x2   :  { %v41_v3 = vld [vmem:[%s1886_s1] sm:$0xff]  ;;  %v1170_v4 = vcombine.high %v49_v0, %v49_v0  ;;  %v1172_v5 = vcombine.high %v50_v1, %v50_v1  ;;  %v1169_v6 = vcombine.low %v49_v0, %v49_v0  ;;  %v1171_v7 = vcombine.low %v50_v1, %v50_v1  ;;  %v1340_v13 = vld [vmem:[%s1887_s2 + $0xc] ss:$16 sps:$4 sm:$0xff]   ;;  %v1338_v14 = vld [vmem:[%s1887_s2 + $0x8] ss:$16 sps:$4 sm:$0xff]  }
   0x3   :  { %v1337_v8 = vld [vmem:[%s1887_s2 + $0x4] ss:$16 sps:$4 sm:$0xff]   ;;  %v42_v11 = vpack.c.bf16 %v41_v3, %v41_v3  ;;  %v1335_v12 = vld [vmem:[%s1887_s2] ss:$16 sps:$4 sm:$0xff]   ;;  %v48_v16 = vld [vmem:[%s1887_s2 + $0x28] sm:$0xff] }
   0x4   :  { %1173 = vmatprep.subr.msk.bf16.mxu0 %vm65_vm0, %v1170_v4  ;;  %1175 = vmatprep.subr.msk.bf16.mxu1 %vm65_vm0, %v1172_v5  ;;  %v67_v9 = vsel %vm65_vm0, %v1169_v6, 0  ;;  %v73_v10 = vsel %vm65_vm0, %v1171_v7, 0  ;;  %v47_v15 = vld [vmem:[%s1887_s2 + $0x20] sm:$0xff]  ;;  %v1184_v18 = vcombine.high %v48_v16, %v48_v16  ;;  %v1183_v20 = vcombine.low %v48_v16, %v48_v16  ;;  %v1356_v30 = vld [vmem:[%s1890_s7 + $0x14] ss:$8 sps:$4 sm:$0xff]  }
   0x5   :  { %79 = vmatpush1.bf16.msra.mxu0 %v67_v9  ;;  %120 = vmatpush1.bf16.msra.mxu1 %v73_v10  ;;  %v1182_v17 = vcombine.high %v47_v15, %v47_v15  ;;  %v1181_v19 = vcombine.low %v47_v15, %v47_v15  ;;  %v39_v21 = vld [vmem:[%s1889_s0] sm:$0xff]  ;;  %v1351_v31 = vld [vmem:[%s1888_s5 + $0x10] ss:$8 sps:$4 sm:$0xff]   ;;  %v1365_v37 = vld [vmem:[%s1888_s5 + $0x34] ss:$8 sps:$4 sm:$0xff]  }
   0x6   :  { %206 = vmatprep.subr.bf16.mxu0 %v1337_v8  ;;  %247 = vmatprep.subr.bf16.mxu1 %v1340_v13  ;;  %v1347_v22 = vld [vmem:[%s1888_s5 + $0x4] ss:$8 sps:$4 sm:$0xff]   ;;  %v201_v24 = vsel %vm65_vm0, %v1183_v20, 0  ;;  %v40_v26 = vpack.c.bf16 %v39_v21, %v39_v21  ;;  %v1345_v27 = vld [vmem:[%s1888_s5] ss:$8 sps:$4 sm:$0xff]  }
   0x7   :  { %v195_v23 = vsel %vm65_vm0, %v1181_v19, 0  ;;  %v1350_v25 = vld [vmem:[%s1890_s7 + $0x4] ss:$8 sps:$4 sm:$0xff]   ;;  %v1348_v28 = vld [vmem:[%s1890_s7] ss:$8 sps:$4 sm:$0xff]  }
   0x8   :  { %1174 = vmatmul.mubr.msk.bf16.vlgmr.msra.gmra.mrb[0].mxu0 %vm61_vm1, %v42_v11  ;;  %1176 = vmatmul.mubr.msk.bf16.vlgmr.msra.gmra.mrb[0].mxu1 %vm61_vm1, %v42_v11  ;;  %v1354_v32 = vld [vmem:[%s1890_s7 + $0x10] ss:$8 sps:$4 sm:$0xff]   ;;  %v1359_v33 = vld [vmem:[%s1888_s5 + $0x24] ss:$8 sps:$4 sm:$0xff]   ;;  %v1357_v35 = vld [vmem:[%s1888_s5 + $0x20] ss:$8 sps:$4 sm:$0xff]  }
   0x9   :  { %207 = vmatpush1.bf16.msra.mxu0 %v1335_v12  ;;  %248 = vmatpush1.bf16.msra.mxu1 %v1338_v14  ;;  %v1362_v34 = vld [vmem:[%s1890_s7 + $0x24] ss:$8 sps:$4 sm:$0xff]   ;;  %v1360_v36 = vld [vmem:[%s1890_s7 + $0x20] ss:$8 sps:$4 sm:$0xff]   ;;  %v1368_v38 = vld [vmem:[%s1890_s7 + $0x34] ss:$8 sps:$4 sm:$0xff]  }
   0xa   :  { %1185 = vmatprep.subr.msk.bf16.mxu0 %vm65_vm0, %v1182_v17  ;;  %1187 = vmatprep.subr.msk.bf16.mxu1 %vm65_vm0, %v1184_v18  ;;  %v1363_v39 = vld [vmem:[%s1888_s5 + $0x30] ss:$8 sps:$4 sm:$0xff]   ;;  %v1371_v41 = vld [vmem:[%s1888_s5 + $0x44] ss:$8 sps:$4 sm:$0xff]   ;;  %v1369_v43 = vld [vmem:[%s1888_s5 + $0x40] ss:$8 sps:$4 sm:$0xff]  }
   0xb   :  { %238 = vmatprep.mubr.bf16.mxu0 %v1473_v2  ;;  %279 = vmatprep.mubr.bf16.mxu1 %v1473_v2  ;;  %v1366_v40 = vld [vmem:[%s1890_s7 + $0x30] ss:$8 sps:$4 sm:$0xff]   ;;  %v1374_v42 = vld [vmem:[%s1890_s7 + $0x44] ss:$8 sps:$4 sm:$0xff]   ;;  %v1372_v44 = vld [vmem:[%s1890_s7 + $0x40] ss:$8 sps:$4 sm:$0xff]  }
   0xc   :  { %v1377_v45 = vld [vmem:[%s1888_s5 + $0x54] ss:$8 sps:$4 sm:$0xff]   ;;  %v1375_v47 = vld [vmem:[%s1888_s5 + $0x50] ss:$8 sps:$4 sm:$0xff]   ;;  %v1383_v49 = vld [vmem:[%s1888_s5 + $0x64] ss:$8 sps:$4 sm:$0xff]  }
   0xd   :  { %209 = vmatpush1.bf16.msra.mxu0 %v195_v23  ;;  %250 = vmatpush1.bf16.msra.mxu1 %v201_v24  ;;  %v1380_v46 = vld [vmem:[%s1890_s7 + $0x54] ss:$8 sps:$4 sm:$0xff]   ;;  %v1378_v48 = vld [vmem:[%s1890_s7 + $0x50] ss:$8 sps:$4 sm:$0xff]   ;;  %v1386_v50 = vld [vmem:[%s1890_s7 + $0x64] ss:$8 sps:$4 sm:$0xff]  }
   0xe   :  { %526 = vmatprep.subr.bf16.mxu0 %v1347_v22  ;;  %773 = vmatprep.subr.bf16.mxu1 %v1350_v25  ;;  %v1381_v51 = vld [vmem:[%s1888_s5 + $0x60] ss:$8 sps:$4 sm:$0xff]   ;;  %v1389_v53 = vld [vmem:[%s1888_s5 + $0x74] ss:$8 sps:$4 sm:$0xff]   ;;  %v1387_v55 = vld [vmem:[%s1888_s5 + $0x70] ss:$8 sps:$4 sm:$0xff]  }
   0xf   :  { %v1384_v52 = vld [vmem:[%s1890_s7 + $0x60] ss:$8 sps:$4 sm:$0xff]   ;;  %v1392_v54 = vld [vmem:[%s1890_s7 + $0x74] ss:$8 sps:$4 sm:$0xff]   ;;  %v1390_v56 = vld [vmem:[%s1890_s7 + $0x70] ss:$8 sps:$4 sm:$0xff]  }
  0x10   :  { %1186 = vmatmul.mubr.msk.bf16.vlgmr.msra.gmra.mrb[4].mxu0 %vm190_vm2, %v40_v26  ;;  %1188 = vmatmul.mubr.msk.bf16.vlgmr.msra.gmra.mrb[4].mxu1 %vm190_vm2, %v40_v26  ;;  %v1395_v57 = vld [vmem:[%s1888_s5 + $0x84] ss:$8 sps:$4 sm:$0xff]   ;;  %v1393_v59 = vld [vmem:[%s1888_s5 + $0x80] ss:$8 sps:$4 sm:$0xff]   ;;  %v1401_v61 = vld [vmem:[%s1888_s5 + $0x94] ss:$8 sps:$4 sm:$0xff]  }
  0x11   :  { %527 = vmatpush1.bf16.msra.mxu0 %v1345_v27  ;;  %774 = vmatpush1.bf16.msra.mxu1 %v1348_v28  ;;  %v1398_v58 = vld [vmem:[%s1890_s7 + $0x84] ss:$8 sps:$4 sm:$0xff]   ;;  %v1396_v60 = vld [vmem:[%s1890_s7 + $0x80] ss:$8 sps:$4 sm:$0xff]   ;;  %v1404_v62 = vld [vmem:[%s1890_s7 + $0x94] ss:$8 sps:$4 sm:$0xff]   ;;  %v290_v27 = vlaneseq }
  0x12   :  { %528 = vmatprep.subr.bf16.mxu0 %v1353_v29  ;;  %775 = vmatprep.subr.bf16.mxu1 %v1356_v30  ;;  %v1399_v63 = vld [vmem:[%s1888_s5 + $0x90] ss:$8 sps:$4 sm:$0xff]   ;;  %v1407_v1 = vld [vmem:[%s1888_s5 + $0xa4] ss:$8 sps:$4 sm:$0xff]   ;;  %v1405_v3 = vld [vmem:[%s1888_s5 + $0xa0] ss:$8 sps:$4 sm:$0xff]  }
  0x13   :  { %v1402_v0 = vld [vmem:[%s1890_s7 + $0x90] ss:$8 sps:$4 sm:$0xff]   ;;  %v1410_v2 = vld [vmem:[%s1890_s7 + $0xa4] ss:$8 sps:$4 sm:$0xff]   ;;  %v1408_v4 = vld [vmem:[%s1890_s7 + $0xa0] ss:$8 sps:$4 sm:$0xff]  }
  0x14   :  { %v1413_v5 = vld [vmem:[%s1888_s5 + $0xb4] ss:$8 sps:$4 sm:$0xff]   ;;  %v1411_v7 = vld [vmem:[%s1888_s5 + $0xb0] ss:$8 sps:$4 sm:$0xff]   ;;  %v1419_v9 = vld [vmem:[%s1888_s5 + $0xc4] ss:$8 sps:$4 sm:$0xff]  }
  0x15   :  { %529 = vmatpush1.bf16.msra.mxu0 %v1351_v31  ;;  %776 = vmatpush1.bf16.msra.mxu1 %v1354_v32  ;;  %v1416_v6 = vld [vmem:[%s1890_s7 + $0xb4] ss:$8 sps:$4 sm:$0xff]   ;;  %v1414_v8 = vld [vmem:[%s1890_s7 + $0xb0] ss:$8 sps:$4 sm:$0xff]   ;;  %v1422_v10 = vld [vmem:[%s1890_s7 + $0xc4] ss:$8 sps:$4 sm:$0xff]  }
  0x16   :  { %530 = vmatprep.subr.bf16.mxu0 %v1359_v33  ;;  %777 = vmatprep.subr.bf16.mxu1 %v1362_v34  ;;  %v1417_v11 = vld [vmem:[%s1888_s5 + $0xc0] ss:$8 sps:$4 sm:$0xff]   ;;  %v1425_v13 = vld [vmem:[%s1888_s5 + $0xd4] ss:$8 sps:$4 sm:$0xff]   ;;  %v1423_v14 = vld [vmem:[%s1888_s5 + $0xd0] ss:$8 sps:$4 sm:$0xff]  }
  0x17   :  { %v1420_v12 = vld [vmem:[%s1890_s7 + $0xc0] ss:$8 sps:$4 sm:$0xff]   ;;  %v1426_v15 = vld [vmem:[%s1890_s7 + $0xd0] ss:$8 sps:$4 sm:$0xff]   ;;  %v1428_v16 = vld [vmem:[%s1890_s7 + $0xd4] ss:$8 sps:$4 sm:$0xff]  }
  0x18   :  { %v1431_v17 = vld [vmem:[%s1888_s5 + $0xe4] ss:$8 sps:$4 sm:$0xff]   ;;  %v1429_v19 = vld [vmem:[%s1888_s5 + $0xe0] ss:$8 sps:$4 sm:$0xff]   ;;  %v1437_v21 = vld [vmem:[%s1888_s5 + $0xf4] ss:$8 sps:$4 sm:$0xff]  }
  0x19   :  { %531 = vmatpush1.bf16.msra.mxu0 %v1357_v35  ;;  %778 = vmatpush1.bf16.msra.mxu1 %v1360_v36  ;;  %v1434_v18 = vld [vmem:[%s1890_s7 + $0xe4] ss:$8 sps:$4 sm:$0xff]   ;;  %v1432_v20 = vld [vmem:[%s1890_s7 + $0xe0] ss:$8 sps:$4 sm:$0xff]   ;;  %v1440_v22 = vld [vmem:[%s1890_s7 + $0xf4] ss:$8 sps:$4 sm:$0xff]  }
  0x1a   :  { %532 = vmatprep.subr.bf16.mxu0 %v1365_v37  ;;  %779 = vmatprep.subr.bf16.mxu1 %v1368_v38  ;;  %v1435_v23 = vld [vmem:[%s1888_s5 + $0xf0] ss:$8 sps:$4 sm:$0xff]   ;;  %v1441_v25 = vld [vmem:[%s1891_s9 + $0x40] sm:$0xff]   ;;  %v291_v28 = vshrl.u32 %v290_v27, 7  ;;  %v1464_v27 = vld [vmem:[%s1891_s9 + $0xa8] sm:$0xff]  }
  0x1b   :  { %v1438_v24 = vld [vmem:[%s1890_s7 + $0xf0] ss:$8 sps:$4 sm:$0xff]   ;;  %v1442_v26 = vld [vmem:[%s1891_s9 + $0xc0] sm:$0xff]  }
  0x1c   :  { %v1770_v37 = vsub.s32 0, %v291_v28  ;;  %v300_v38 = vsub.s32 2, %v291_v28 }
  0x1d   :  { %533 = vmatpush1.bf16.msra.mxu0 %v1363_v39  ;;  %780 = vmatpush1.bf16.msra.mxu1 %v1366_v40  ;;  %v288_v39 = vld [vmem:[%s1892_s4] sm:$0xf]  ;;  %v1775_v40 = vsub.s32 1, %v291_v28 }
  0x1e   :  { %534 = vmatprep.subr.bf16.mxu0 %v1371_v41  ;;  %781 = vmatprep.subr.bf16.mxu1 %v1374_v42  ;;  %v304_v41 = vsub.s32 3, %v291_v28  ;;  %v293_v42 = vrot.slane %v288_v39, %v1770_v37  ;;  %v1465_v28 = vld [vmem:[%s1891_s9 + $0x70] sm:$0xff]  }
  0x21   :  { %535 = vmatpush1.bf16.msra.mxu0 %v1369_v43  ;;  %782 = vmatpush1.bf16.msra.mxu1 %v1372_v44  ;;  %v301_v43 = vrot.slane %v288_v39, %v300_v38  ;;  %v601_v38 = vld [vmem:[%s1894_s8] sm:$0x3] }
  0x22   :  { %536 = vmatprep.subr.bf16.mxu0 %v1377_v45  ;;  %783 = vmatprep.subr.bf16.mxu1 %v1380_v46  ;;  %v297_v46 = vrot.slane %v288_v39, %v1775_v40 }
  0x25   :  { %537 = vmatpush1.bf16.msra.mxu0 %v1375_v47  ;;  %784 = vmatpush1.bf16.msra.mxu1 %v1378_v48  ;;  %v305_v47 = vrot.slane %v288_v39, %v304_v41  ;;  %v606_v41 = vrot.slane %v601_v38, %v1770_v37 }
  0x26   :  { %538 = vmatprep.subr.bf16.mxu0 %v1383_v49  ;;  %785 = vmatprep.subr.bf16.mxu1 %v1386_v50 }
  0x29   :  { %539 = vmatpush1.bf16.msra.mxu0 %v1381_v51  ;;  %786 = vmatpush1.bf16.msra.mxu1 %v1384_v52 }
  0x2a   :  { %540 = vmatprep.subr.bf16.mxu0 %v1389_v53  ;;  %787 = vmatprep.subr.bf16.mxu1 %v1392_v54 }
  0x2d   :  { %541 = vmatpush1.bf16.msra.mxu0 %v1387_v55  ;;  %788 = vmatpush1.bf16.msra.mxu1 %v1390_v56 }
  0x2e   :  { %542 = vmatprep.subr.bf16.mxu0 %v1395_v57  ;;  %789 = vmatprep.subr.bf16.mxu1 %v1398_v58 }
  0x31   :  { %543 = vmatpush1.bf16.msra.mxu0 %v1393_v59  ;;  %790 = vmatpush1.bf16.msra.mxu1 %v1396_v60 }
  0x32   :  { %544 = vmatprep.subr.bf16.mxu0 %v1401_v61  ;;  %791 = vmatprep.subr.bf16.mxu1 %v1404_v62 }
  0x35   :  { %545 = vmatpush1.bf16.msra.mxu0 %v1399_v63  ;;  %792 = vmatpush1.bf16.msra.mxu1 %v1402_v0 }
  0x36   :  { %546 = vmatprep.subr.bf16.mxu0 %v1407_v1  ;;  %793 = vmatprep.subr.bf16.mxu1 %v1410_v2 }
  0x39   :  { %547 = vmatpush1.bf16.msra.mxu0 %v1405_v3  ;;  %794 = vmatpush1.bf16.msra.mxu1 %v1408_v4  ;;  %v1443_v4 = vld [vmem:[%s1891_s9] sm:$0xff]  }
  0x3a   :  { %548 = vmatprep.subr.bf16.mxu0 %v1413_v5  ;;  %795 = vmatprep.subr.bf16.mxu1 %v1416_v6  ;;  %v1444_v5 = vld [vmem:[%s1891_s9 + $0x80] sm:$0xff]  }
  0x3d   :  { %549 = vmatpush1.bf16.msra.mxu0 %v1411_v7  ;;  %796 = vmatpush1.bf16.msra.mxu1 %v1414_v8  ;;  %v1445_v8 = vld [vmem:[%s1891_s9 + $0x48] sm:$0xff]  }
  0x3e   :  { %550 = vmatprep.subr.bf16.mxu0 %v1419_v9  ;;  %797 = vmatprep.subr.bf16.mxu1 %v1422_v10  ;;  %v1446_v9 = vld [vmem:[%s1891_s9 + $0xc8] sm:$0xff]  }
  0x3f   :  { %v1447_v10 = vld [vmem:[%s1891_s9 + $0x8] sm:$0xff]  }
  0x41   :  { %551 = vmatpush1.bf16.msra.mxu0 %v1417_v11  ;;  %798 = vmatpush1.bf16.msra.mxu1 %v1420_v12  ;;  %v1448_v11 = vld [vmem:[%s1891_s9 + $0x88] sm:$0xff]   ;;  %v1449_v12 = vld [vmem:[%s1891_s9 + $0x50] sm:$0xff]  }
  0x42   :  { %552 = vmatprep.subr.bf16.mxu0 %v1425_v13  ;;  %799 = vmatprep.subr.bf16.mxu1 %v1428_v16  ;;  %v1450_v13 = vld [vmem:[%s1891_s9 + $0xd0] sm:$0xff]   ;;  %v1453_v16 = vld [vmem:[%s1891_s9 + $0x58] sm:$0xff]  }
  0x45   :  { %553 = vmatpush1.bf16.msra.mxu0 %v1423_v14  ;;  %800 = vmatpush1.bf16.msra.mxu1 %v1426_v15  ;;  %v1451_v14 = vld [vmem:[%s1891_s9 + $0x10] sm:$0xff]  }
  0x46   :  { %554 = vmatprep.subr.bf16.mxu0 %v1431_v17  ;;  %801 = vmatprep.subr.bf16.mxu1 %v1434_v18  ;;  %v1452_v15 = vld [vmem:[%s1891_s9 + $0x90] sm:$0xff]   ;;  %v1454_v17 = vld [vmem:[%s1891_s9 + $0xd8] sm:$0xff]  }
  0x47   :  { %v1455_v18 = vld [vmem:[%s1891_s9 + $0x18] sm:$0xff]  }
  0x49   :  { %555 = vmatpush1.bf16.msra.mxu0 %v1429_v19  ;;  %802 = vmatpush1.bf16.msra.mxu1 %v1432_v20  ;;  %v1456_v19 = vld [vmem:[%s1891_s9 + $0x98] sm:$0xff]   ;;  %v1457_v20 = vld [vmem:[%s1891_s9 + $0x60] sm:$0xff]  }
  0x4a   :  { %556 = vmatprep.subr.bf16.mxu0 %v1437_v21  ;;  %803 = vmatprep.subr.bf16.mxu1 %v1440_v22  ;;  %v1458_v21 = vld [vmem:[%s1891_s9 + $0xe0] sm:$0xff]  }
  0x4b   :  { %v1459_v22 = vld [vmem:[%s1891_s9 + $0x20] sm:$0xff]  }
  0x4d   :  { %557 = vmatpush1.bf16.msra.mxu0 %v1435_v23  ;;  %804 = vmatpush1.bf16.msra.mxu1 %v1438_v24  ;;  %v1460_v23 = vld [vmem:[%s1891_s9 + $0xa0] sm:$0xff]   ;;  %v1461_v24 = vld [vmem:[%s1891_s9 + $0x68] sm:$0xff]  }
  0x4e   :  { %1286 = vmatprep.subr.bf16.mxu0 %v1441_v25  ;;  %1308 = vmatprep.subr.bf16.mxu1 %v1442_v26  ;;  %v1462_v25 = vld [vmem:[%s1891_s9 + $0xe8] sm:$0xff]  }
  0x4f   :  { %v1463_v26 = vld [vmem:[%s1891_s9 + $0x28] sm:$0xff]  }
  0xdb   :  { %v112_v29 = vpop.f32.mrb[0].mxu0  ;;  %v153_v30 = vpop.f32.mrb[0].mxu1 }
  0xdc   :  { %v114_v31 = vpop.f32.mrb[1].mxu0  ;;  %v155_v32 = vpop.f32.mrb[1].mxu1 }
  0xdd   :  { %v116_v33 = vpop.f32.mrb[2].mxu0  ;;  %v157_v34 = vpop.f32.mrb[2].mxu1 }
  0xde   :  { %v117_v35 = vpop.f32.mrb[3].mxu0  ;;  %v158_v36 = vpop.f32.mrb[3].mxu1  ;;  %v1470_v33 = vld [vmem:[%s1891_s9 + $0xf8] sm:$0xff]  }
  0xdf   :  { %v1471_v34 = vld [vmem:[%s1891_s9 + $0x38] sm:$0xff]   ;;  %v354_v36 = vld [vmem:[%s1893_s6] sm:$0x3] }
  0xe0   :  { %v1472_v35 = vld [vmem:[%s1891_s9 + $0xb8] sm:$0xff]   ;;  %v359_v39 = vrot.slane %v354_v36, %v1770_v37 }
  0xe3   :  { %v240_v44 = vpop.f32.mrb[4].mxu0  ;;  %v281_v45 = vpop.f32.mrb[4].mxu1 }
  0xe4   :  { %v241_v48 = vadd.f32 %v240_v44, %v112_v29  ;;  %v282_v49 = vadd.f32 %v281_v45, %v153_v30  ;;  %v242_v50 = vpop.f32.mrb[5].mxu0  ;;  %v283_v51 = vpop.f32.mrb[5].mxu1  ;;  %v1466_v29 = vld [vmem:[%s1891_s9 + $0xf0] sm:$0xff]  }
  0xe5   :  { %v243_v52 = vadd.f32 %v242_v50, %v114_v31  ;;  %v284_v53 = vadd.f32 %v283_v51, %v155_v32  ;;  %v244_v54 = vpop.f32.mrb[6].mxu0  ;;  %v285_v55 = vpop.f32.mrb[6].mxu1  ;;  %v1467_v30 = vld [vmem:[%s1891_s9 + $0x30] sm:$0xff]   ;;  %v1469_v32 = vld [vmem:[%s1891_s9 + $0x78] sm:$0xff]  }
  0xe6   :  { %v310_v56 = vadd.f32 %v293_v42, %v241_v48  ;;  %v312_v57 = vadd.f32 %v301_v43, %v282_v49  ;;  %v245_v58 = vpop.f32.mrb[7].mxu0  ;;  %v286_v59 = vpop.f32.mrb[7].mxu1  ;;  %v1468_v31 = vld [vmem:[%s1891_s9 + $0xb0] sm:$0xff]   ;;  %v363_v42 = vrot.slane %v354_v36, %v1775_v40  ;;  %v610_v43 = vrot.slane %v601_v38, %v1775_v40 }
  0xe7   :  { %v311_v60 = vadd.f32 %v297_v46, %v243_v52  ;;  %v313_v61 = vadd.f32 %v305_v47, %v284_v53 }
  0xe8   :  { %v314_v62 = vmax.f32 %v310_v56, 0.0  ;;  %v316_v63 = vmax.f32 %v312_v57, 0.0 }
  0xe9   :  { %v315_v0 = vmax.f32 %v311_v60, 0.0  ;;  %v317_v1 = vmax.f32 %v313_v61, 0.0 }
  0xea   :  { %v318_v6 = vpack.c.bf16 %v314_v62, %v314_v62  ;;  %v320_v7 = vpack.c.bf16 %v316_v63, %v316_v63 }
  0xeb   :  { %v319_v2 = vpack.c.bf16 %v315_v0, %v315_v0  ;;  %v321_v3 = vpack.c.bf16 %v317_v1, %v317_v1  ;;  %v1253_v0 = vld [vmem:[%s1895_s10] ss:$0 sm:$0xff] }
  0xed   :  { %558 = vmatprep.mubr.bf16.mxu0 %v319_v2  ;;  %805 = vmatprep.mubr.bf16.mxu1 %v321_v3 }
  0xee   :  { %559 = vmatmul.mubr.bf16.vlgmr.msra.gmra.mrb[8].mxu0 %v318_v6  ;;  %806 = vmatmul.mubr.bf16.vlgmr.msra.gmra.mrb[8].mxu1 %v320_v7 }
  0xef   :  { %1287 = vmatpush3.bf16.msra.mxu0 %v1443_v4  ;;  %1309 = vmatpush3.bf16.msra.mxu1 %v1444_v5 }
  0xf0   :  { %1288 = vmatprep.subr.bf16.mxu0 %v1445_v8  ;;  %1310 = vmatprep.subr.bf16.mxu1 %v1446_v9 }
  0xf3   :  { %1289 = vmatpush3.bf16.msra.mxu0 %v1447_v10  ;;  %1311 = vmatpush3.bf16.msra.mxu1 %v1448_v11 }
  0xf4   :  { %1290 = vmatprep.subr.bf16.mxu0 %v1449_v12  ;;  %1312 = vmatprep.subr.bf16.mxu1 %v1450_v13 }
  0xf7   :  { %1291 = vmatpush3.bf16.msra.mxu0 %v1451_v14  ;;  %1313 = vmatpush3.bf16.msra.mxu1 %v1452_v15 }
  0xf8   :  { %1292 = vmatprep.subr.bf16.mxu0 %v1453_v16  ;;  %1314 = vmatprep.subr.bf16.mxu1 %v1454_v17 }
  0xfb   :  { %1293 = vmatpush3.bf16.msra.mxu0 %v1455_v18  ;;  %1315 = vmatpush3.bf16.msra.mxu1 %v1456_v19 }
  0xfc   :  { %1294 = vmatprep.subr.bf16.mxu0 %v1457_v20  ;;  %1316 = vmatprep.subr.bf16.mxu1 %v1458_v21 }
  0xff   :  { %1295 = vmatpush3.bf16.msra.mxu0 %v1459_v22  ;;  %1317 = vmatpush3.bf16.msra.mxu1 %v1460_v23 }
 0x100   :  { %1296 = vmatprep.subr.bf16.mxu0 %v1461_v24  ;;  %1318 = vmatprep.subr.bf16.mxu1 %v1462_v25 }
 0x103   :  { %1297 = vmatpush3.bf16.msra.mxu0 %v1463_v26  ;;  %1319 = vmatpush3.bf16.msra.mxu1 %v1464_v27 }
 0x104   :  { %1298 = vmatprep.subr.bf16.mxu0 %v1465_v28  ;;  %1320 = vmatprep.subr.bf16.mxu1 %v1466_v29 }
 0x107   :  { %1299 = vmatpush3.bf16.msra.mxu0 %v1467_v30  ;;  %1321 = vmatpush3.bf16.msra.mxu1 %v1468_v31 }
 0x108   :  { %1300 = vmatprep.subr.bf16.mxu0 %v1469_v32  ;;  %1322 = vmatprep.subr.bf16.mxu1 %v1470_v33 }
 0x10b   :  { %1301 = vmatpush3.bf16.msra.mxu0 %v1471_v34  ;;  %1323 = vmatpush3.bf16.msra.mxu1 %v1472_v35 }
 0x1c1   :  { %v560_v44 = vpop.f32.mrb[8].mxu0  ;;  %v807_v45 = vpop.f32.mrb[8].mxu1 }
 0x1c2   :  { %v561_v46 = vadd.f32 %v560_v44, %v359_v39  ;;  %v808_v47 = vadd.f32 %v807_v45, %v606_v41  ;;  %v562_v48 = vpop.f32.mrb[9].mxu0  ;;  %v809_v49 = vpop.f32.mrb[9].mxu1 }
 0x1c3   :  { %v563_v50 = vadd.f32 %v562_v48, %v363_v42  ;;  %v810_v51 = vadd.f32 %v809_v49, %v610_v43  ;;  %v564_v52 = vpop.f32.mrb[10].mxu0  ;;  %v811_v53 = vpop.f32.mrb[10].mxu1 }
 0x1c4   :  { %v567_v54 = vmax.f32 %v561_v46, 0.0  ;;  %v814_v55 = vmax.f32 %v808_v47, 0.0  ;;  %v565_v56 = vpop.f32.mrb[11].mxu0  ;;  %v812_v57 = vpop.f32.mrb[11].mxu1 }
 0x1c5   :  { %v568_v58 = vmax.f32 %v563_v50, 0.0  ;;  %v815_v37 = vmax.f32 %v810_v51, 0.0 }
 0x1c6   :  { %v816_v61 = vpack.c.bf16 %v567_v54, %v567_v54  ;;  %v818_v40 = vpack.c.bf16 %v814_v55, %v814_v55 }
 0x1c7   :  { %v817_v59 = vpack.c.bf16 %v568_v58, %v568_v58  ;;  %v819_v60 = vpack.c.bf16 %v815_v37, %v815_v37 }
 0x1c9   :  { %1115 = vmatprep.mubr.bf16.mxu0 %v817_v59  ;;  %1155 = vmatprep.mubr.bf16.mxu1 %v819_v60 }
 0x1ca   :  { %1116 = vmatmul.mubr.bf16.vlgmr.msra.gmra.mrb[12].mxu0 %v816_v61  ;;  %1156 = vmatmul.mubr.bf16.vlgmr.msra.gmra.mrb[12].mxu1 %v818_v40 }
 0x29d   :  { %v1302_v62 = vpop.f32.mrb[12].mxu0  ;;  %v1324_v63 = vpop.f32.mrb[12].mxu1 }
 0x29e   :  { %v1303_v1 = vpop.f32.mrb[13].mxu0  ;;  %v1325_v2 = vpop.f32.mrb[13].mxu1 }
 0x29f   :  { %v1304_v3 = vadd.f32 %v1303_v1, %v1302_v62  ;;  %v1326_v4 = vadd.f32 %v1325_v2, %v1324_v63  ;;  %v1305_v5 = vpop.f32.mrb[14].mxu0  ;;  %v1327_v6 = vpop.f32.mrb[14].mxu1 }
 0x2a0   :  { %v1306_v7 = vpop.f32.mrb[15].mxu0  ;;  %v1328_v8 = vpop.f32.mrb[15].mxu1 }
 0x2a1   :  { %v1118_v9 = vadd.f32 %v1304_v3, %v1253_v0 }
 0x2a3   :  { %v1158_v10 = vadd.f32 %v1326_v4, %v1118_v9 }
 0x2a5   :  { %1164 = vst.msk [vmem:[%s1896_s11] sm:$0xff] %vm1163_vm3, %v1158_v10 }

</bundles_post_ra>
